<compile_context>
chip_gen: v7x
topology: tpu7x:2x2x1
jax: 0.10.0
libtpu: 0.0.40
codegen_flags: <defaults>
</compile_context>

<pallas_src>
import functools

import jax
import jax.numpy as jnp
from jax.experimental import pallas as pl
from jax.experimental.pallas import tpu as pltpu


def _dense_block_kernel(x_ref, w_ref, b_ref, out_ref, halo_ref, *,
                        dilation, C, F, NB, TT):
    # x_ref:    (NB, C, TT)       current-tap input tile (time on lanes, aligned)
    # w_ref:    (2F, 2C)          packed [f; g] x [lag-d | current] weights
    # b_ref:    (2F, 1)           packed [f; g] bias
    # out_ref:  (NB, C + F, TT)   rows [0:C) passthrough x, rows [C:C+F) activations
    # halo_ref: (NB, C, d) VMEM   last d time columns of the previous time tile
    d = dilation
    t = pl.program_id(1)

    @pl.when(t == 0)
    def _():
        halo_ref[...] = jnp.zeros_like(halo_ref)       # causal zero history

    w = w_ref[...]                                     # (2F, 2C)
    b = b_ref[...]                                     # (2F, 1)

    for n in range(NB):                                # static batch-fold loop
        x_n = x_ref[n]                                 # (C, TT), current tap
        # lag-d tap: previous tile's tail (or zeros) followed by x[:, :TT-d]
        x_prev = jnp.concatenate([halo_ref[n], x_n[:, :TT - d]], axis=1)   # (C, TT)
        rhs = jnp.concatenate([x_prev, x_n], axis=0)                       # (2C, TT)
        # single fused MXU call for both taps and both (f, g) convolutions
        pre = jnp.dot(w, rhs, preferred_element_type=jnp.float32) + b      # (2F, TT)
        # tanh(f) * sigmoid(g); sigmoid via the tanh identity (EUP-only path)
        act = jnp.tanh(pre[:F, :]) * (0.5 * (jnp.tanh(0.5 * pre[F:, :]) + 1.0))
        # fused channel concat -> one full-block store
        out_ref[n] = jnp.concatenate([x_n, act.astype(out_ref.dtype)], axis=0)

    @pl.when(t + 1 < pl.num_programs(1))
    def _():
        halo_ref[...] = x_ref[:, :, TT - d:]           # carry halo to next time tile


def _choose_time_tile(T, d):
    """Lane-dense time tile: multiple of 128, divides T, strictly larger than d."""
    if T % 128 == 0:
        for tt in (512, 256, 128):
            if T % tt == 0 and tt > d:
                return tt
    return T


def _largest_divisor_leq(n, limit):
    for cand in range(min(n, limit), 0, -1):
        if n % cand == 0:
            return cand
    return 1


def dense_block_forward(x_ncw, params, dilation):
    """x_ncw: (N, C, T) float32 (PyTorch NCW layout). Returns (N, C + F, T)."""
    w_f, b_f, w_g, b_g = params          # w_*: (F, C, 2), b_*: (F,)
    N, C, T = x_ncw.shape
    F = w_f.shape[0]
    d = int(dilation)
    assert 0 < d < T, "causal conv kernel assumes 0 < dilation < T"

    # Pack f/g filters and both taps into one LHS:
    # rows [0:F)=f, [F:2F)=g; cols [0:C) multiply x[t-d], cols [C:2C) multiply x[t].
    w_packed = jnp.concatenate(
        [jnp.concatenate([w_f[:, :, 0], w_g[:, :, 0]], axis=0),   # lag-d tap
         jnp.concatenate([w_f[:, :, 1], w_g[:, :, 1]], axis=0)],  # current tap
        axis=1)                                                    # (2F, 2C)
    b_packed = jnp.concatenate([b_f, b_g]).reshape(2 * F, 1)       # (2F, 1)

    TT = _choose_time_tile(T, d)
    # Fold batch elements into one grid step when the time block is lane-sparse
    # (amortizes per-step overhead at tiny T); capped to keep the unroll small.
    NB = _largest_divisor_leq(N, min(16, max(1, 4096 // TT))) if TT < 128 else 1

    kernel = functools.partial(_dense_block_kernel, dilation=d, C=C, F=F,
                               NB=NB, TT=TT)

    out = pl.pallas_call(
        kernel,
        out_shape=jax.ShapeDtypeStruct((N, C + F, T), x_ncw.dtype),
        grid_spec=pltpu.PrefetchScalarGridSpec(
            num_scalar_prefetch=0,
            grid=(N // NB, T // TT),
            in_specs=[
                pl.BlockSpec((NB, C, TT), lambda n, t: (n, 0, t)),     # x
                pl.BlockSpec((2 * F, 2 * C), lambda n, t: (0, 0)),     # packed weights
                pl.BlockSpec((2 * F, 1), lambda n, t: (0, 0)),         # packed bias
            ],
            out_specs=pl.BlockSpec((NB, C + F, TT), lambda n, t: (n, 0, t)),
            scratch_shapes=[pltpu.VMEM((NB, C, d), x_ncw.dtype)],      # time halo
        ),
        compiler_params=pltpu.CompilerParams(
            dimension_semantics=("parallel", "arbitrary"),
            vmem_limit_bytes=32 * 1024 * 1024),
    )(x_ncw, w_packed, b_packed)
    return out


def _reference(x_ncw, params, dilation):
    """Pure-JAX reference of DenseBlock.forward (direct causal-conv formula)."""
    w_f, b_f, w_g, b_g = params
    N, C, T = x_ncw.shape
    d = dilation
    x_prev = jnp.pad(x_ncw, ((0, 0), (0, 0), (d, 0)))[:, :, :T]      # (N, C, T)

    def conv(w, b):
        return (jnp.einsum("nct,fc->nft", x_prev, w[:, :, 0])
                + jnp.einsum("nct,fc->nft", x_ncw, w[:, :, 1])
                + b[None, :, None])

    act = jnp.tanh(conv(w_f, b_f)) * jax.nn.sigmoid(conv(w_g, b_g))
    return jnp.concatenate([x_ncw, act], axis=1)


def _make_params(key, C, filters, kernel_size):
    kwf, kbf, kwg, kbg = jax.random.split(key, 4)
    scale = 1.0 / (C * kernel_size) ** 0.5
    w_f = jax.random.uniform(kwf, (filters, C, kernel_size), jnp.float32, -scale, scale)
    b_f = jax.random.uniform(kbf, (filters,), jnp.float32, -scale, scale)
    w_g = jax.random.uniform(kwg, (filters, C, kernel_size), jnp.float32, -scale, scale)
    b_g = jax.random.uniform(kbg, (filters,), jnp.float32, -scale, scale)
    return (w_f, b_f, w_g, b_g)


if __name__ == "__main__":
    key = jax.random.PRNGKey(0)
    k1, k2, k3, k4 = jax.random.split(key, 4)

    # Case 1: DenseBlock(in_channels=4, dilation=2, filters=8) at the tiny test shape
    # (exercises the batch-fold / single-time-block path).
    N, C, T, dilation, filters = 2, 4, 16, 2, 8
    x = jax.random.normal(k1, (N, C, T), dtype=jnp.float32)
    params = _make_params(k2, C, filters, 2)
    out = jax.block_until_ready(dense_block_forward(x, params, dilation))
    ref = _reference(x, params, dilation)
    assert out.shape == (N, C + filters, T)
    assert jnp.allclose(out, ref, atol=1e-5, rtol=1e-5)

    # Case 2: longer sequence (exercises the lane-dense time tiling + halo carry).
    N2, C2, T2, dil2, filt2 = 2, 4, 1024, 4, 8
    x2 = jax.random.normal(k3, (N2, C2, T2), dtype=jnp.float32)
    params2 = _make_params(k4, C2, filt2, 2)
    out2 = jax.block_until_ready(dense_block_forward(x2, params2, dil2))
    ref2 = _reference(x2, params2, dil2)
    assert out2.shape == (N2, C2 + filt2, T2)
    assert jnp.allclose(out2, ref2, atol=1e-5, rtol=1e-5)

    print("KERNEL_OK")
</pallas_src>

<mosaic_0001>
module attributes {stable_mosaic.version = 11 : i64} {
  func.func @_dense_block_kernel(%arg0: i32, %arg1: i32, %arg2: memref<2x4x16xf32, #tpu.memory_space<vmem>>, %arg3: memref<16x8xf32, #tpu.memory_space<vmem>>, %arg4: memref<16x1xf32, #tpu.memory_space<vmem>>, %arg5: memref<2x12x16xf32, #tpu.memory_space<vmem>>, %arg6: memref<2x4x2xf32, #tpu.memory_space<vmem>>) attributes {dimension_semantics = [#tpu.dimension_semantics<parallel>, #tpu.dimension_semantics<arbitrary>], iteration_bounds = array<i64: 1, 1>, scalar_prefetch = 0 : i64, scratch_operands = 1 : i64, tpu.core_type = #tpu.core_type<tc>, window_params = [{transform_indices = @transform_0, window_bounds = array<i64: 2, 4, 16>}, {pipeline_mode = #tpu.pipeline_mode<synchronous>, transform_indices = @transform_1, window_bounds = array<i64: 16, 8>}, {pipeline_mode = #tpu.pipeline_mode<synchronous>, transform_indices = @transform_2, window_bounds = array<i64: 16, 1>}, {transform_indices = @transform_3, window_bounds = array<i64: 2, 12, 16>}]} {
    %c0_i32 = arith.constant 0 : i32
    %0 = arith.cmpi eq, %arg1, %c0_i32 : i32
    %1 = arith.extui %0 : i1 to i32
    %c0_i32_0 = arith.constant 0 : i32
    %2 = arith.cmpi ne, %1, %c0_i32_0 : i32
    scf.if %2 {
      %cst_30 = arith.constant 0.000000e+00 : f32
      %59 = vector.broadcast %cst_30 : f32 to vector<2x4x2xf32>
      %c0_31 = arith.constant 0 : index
      %c0_32 = arith.constant 0 : index
      %c0_33 = arith.constant 0 : index
      %60 = vector.load %arg6[%c0_31, %c0_32, %c0_33] : memref<2x4x2xf32, #tpu.memory_space<vmem>>, vector<2x4x2xf32>
      tpu.vector_store %arg6[%c0_31, %c0_32, %c0_33], %59 {strides = array<i32>} : memref<2x4x2xf32, #tpu.memory_space<vmem>>, vector<2x4x2xf32>,
    } else {
    }
    %c0 = arith.constant 0 : index
    %c0_1 = arith.constant 0 : index
    %3 = vector.load %arg3[%c0, %c0_1] : memref<16x8xf32, #tpu.memory_space<vmem>>, vector<16x8xf32>
    %c0_2 = arith.constant 0 : index
    %c0_3 = arith.constant 0 : index
    %4 = vector.load %arg4[%c0_2, %c0_3] : memref<16x1xf32, #tpu.memory_space<vmem>>, vector<16x1xf32>
    %c0_4 = arith.constant 0 : index
    %c0_5 = arith.constant 0 : index
    %c0_6 = arith.constant 0 : index
    %5 = vector.load %arg2[%c0_4, %c0_5, %c0_6] : memref<2x4x16xf32, #tpu.memory_space<vmem>>, vector<1x4x16xf32>
    %6 = vector.shape_cast %5 : vector<1x4x16xf32> to vector<4x16xf32>
    %c0_7 = arith.constant 0 : index
    %c0_8 = arith.constant 0 : index
    %c0_9 = arith.constant 0 : index
    %7 = vector.load %arg6[%c0_7, %c0_8, %c0_9] : memref<2x4x2xf32, #tpu.memory_space<vmem>>, vector<1x4x2xf32>
    %8 = vector.shape_cast %7 : vector<1x4x2xf32> to vector<4x2xf32>
    %9 = vector.extract_strided_slice %6 {offsets = [0, 0], sizes = [4, 14], strides = [1, 1]} : vector<4x16xf32> to vector<4x14xf32>
    %10 = tpu.concatenate %8, %9 in 1 : vector<4x2xf32>, vector<4x14xf32> -> vector<4x16xf32>
    %11 = tpu.concatenate %10, %6 in 0 : vector<4x16xf32>, vector<4x16xf32> -> vector<8x16xf32>
    %cst = arith.constant dense<0.000000e+00> : vector<16x16xf32>
    %12 = tpu.matmul %3, %11, %cst {dimension_numbers = #tpu.dot_dimension_numbers<[1], [0], [0], [1], [0, 0, 1, 1], [], []>} : vector<16x8xf32>, vector<8x16xf32>, vector<16x16xf32> -> vector<16x16xf32>
    %13 = vector.broadcast %4 : vector<16x1xf32> to vector<16x16xf32>
    %14 = arith.addf %12, %13 : vector<16x16xf32>
    %15 = vector.extract_strided_slice %14 {offsets = [0, 0], sizes = [8, 16], strides = [1, 1]} : vector<16x16xf32> to vector<8x16xf32>
    %16 = math.tanh %15 : vector<8x16xf32>
    %17 = vector.extract_strided_slice %14 {offsets = [8, 0], sizes = [8, 16], strides = [1, 1]} : vector<16x16xf32> to vector<8x16xf32>
    %cst_10 = arith.constant 5.000000e-01 : f32
    %18 = vector.broadcast %cst_10 : f32 to vector<8x16xf32>
    %19 = arith.mulf %18, %17 : vector<8x16xf32>
    %20 = math.tanh %19 : vector<8x16xf32>
    %cst_11 = arith.constant 1.000000e+00 : f32
    %21 = vector.broadcast %cst_11 : f32 to vector<8x16xf32>
    %22 = arith.addf %20, %21 : vector<8x16xf32>
    %cst_12 = arith.constant 5.000000e-01 : f32
    %23 = vector.broadcast %cst_12 : f32 to vector<8x16xf32>
    %24 = arith.mulf %23, %22 : vector<8x16xf32>
    %25 = arith.mulf %16, %24 : vector<8x16xf32>
    %26 = tpu.concatenate %6, %25 in 0 : vector<4x16xf32>, vector<8x16xf32> -> vector<12x16xf32>
    %c0_13 = arith.constant 0 : index
    %c0_14 = arith.constant 0 : index
    %c0_15 = arith.constant 0 : index
    %27 = vector.load %arg5[%c0_13, %c0_14, %c0_15] : memref<2x12x16xf32, #tpu.memory_space<vmem>>, vector<1x12x16xf32>
    %28 = vector.shape_cast %27 : vector<1x12x16xf32> to vector<12x16xf32>
    %29 = vector.shape_cast %26 : vector<12x16xf32> to vector<1x12x16xf32>
    tpu.vector_store %arg5[%c0_13, %c0_14, %c0_15], %29 {strides = array<i32>} : memref<2x12x16xf32, #tpu.memory_space<vmem>>, vector<1x12x16xf32>,
    %c1 = arith.constant 1 : index
    %c0_16 = arith.constant 0 : index
    %c0_17 = arith.constant 0 : index
    %30 = vector.load %arg2[%c1, %c0_16, %c0_17] : memref<2x4x16xf32, #tpu.memory_space<vmem>>, vector<1x4x16xf32>
    %31 = vector.shape_cast %30 : vector<1x4x16xf32> to vector<4x16xf32>
    %c1_18 = arith.constant 1 : index
    %c0_19 = arith.constant 0 : index
    %c0_20 = arith.constant 0 : index
    %32 = vector.load %arg6[%c1_18, %c0_19, %c0_20] : memref<2x4x2xf32, #tpu.memory_space<vmem>>, vector<1x4x2xf32>
    %33 = vector.shape_cast %32 : vector<1x4x2xf32> to vector<4x2xf32>
    %34 = vector.extract_strided_slice %31 {offsets = [0, 0], sizes = [4, 14], strides = [1, 1]} : vector<4x16xf32> to vector<4x14xf32>
    %35 = tpu.concatenate %33, %34 in 1 : vector<4x2xf32>, vector<4x14xf32> -> vector<4x16xf32>
    %36 = tpu.concatenate %35, %31 in 0 : vector<4x16xf32>, vector<4x16xf32> -> vector<8x16xf32>
    %cst_21 = arith.constant dense<0.000000e+00> : vector<16x16xf32>
    %37 = tpu.matmul %3, %36, %cst_21 {dimension_numbers = #tpu.dot_dimension_numbers<[1], [0], [0], [1], [0, 0, 1, 1], [], []>} : vector<16x8xf32>, vector<8x16xf32>, vector<16x16xf32> -> vector<16x16xf32>
    %38 = vector.broadcast %4 : vector<16x1xf32> to vector<16x16xf32>
    %39 = arith.addf %37, %38 : vector<16x16xf32>
    %40 = vector.extract_strided_slice %39 {offsets = [0, 0], sizes = [8, 16], strides = [1, 1]} : vector<16x16xf32> to vector<8x16xf32>
    %41 = math.tanh %40 : vector<8x16xf32>
    %42 = vector.extract_strided_slice %39 {offsets = [8, 0], sizes = [8, 16], strides = [1, 1]} : vector<16x16xf32> to vector<8x16xf32>
    %cst_22 = arith.constant 5.000000e-01 : f32
    %43 = vector.broadcast %cst_22 : f32 to vector<8x16xf32>
    %44 = arith.mulf %43, %42 : vector<8x16xf32>
    %45 = math.tanh %44 : vector<8x16xf32>
    %cst_23 = arith.constant 1.000000e+00 : f32
    %46 = vector.broadcast %cst_23 : f32 to vector<8x16xf32>
    %47 = arith.addf %45, %46 : vector<8x16xf32>
    %cst_24 = arith.constant 5.000000e-01 : f32
    %48 = vector.broadcast %cst_24 : f32 to vector<8x16xf32>
    %49 = arith.mulf %48, %47 : vector<8x16xf32>
    %50 = arith.mulf %41, %49 : vector<8x16xf32>
    %51 = tpu.concatenate %31, %50 in 0 : vector<4x16xf32>, vector<8x16xf32> -> vector<12x16xf32>
    %c1_25 = arith.constant 1 : index
    %c0_26 = arith.constant 0 : index
    %c0_27 = arith.constant 0 : index
    %52 = vector.load %arg5[%c1_25, %c0_26, %c0_27] : memref<2x12x16xf32, #tpu.memory_space<vmem>>, vector<1x12x16xf32>
    %53 = vector.shape_cast %52 : vector<1x12x16xf32> to vector<12x16xf32>
    %54 = vector.shape_cast %51 : vector<12x16xf32> to vector<1x12x16xf32>
    tpu.vector_store %arg5[%c1_25, %c0_26, %c0_27], %54 {strides = array<i32>} : memref<2x12x16xf32, #tpu.memory_space<vmem>>, vector<1x12x16xf32>,
    %c1_i32 = arith.constant 1 : i32
    %55 = arith.addi %arg1, %c1_i32 : i32
    %c1_i32_28 = arith.constant 1 : i32
    %56 = arith.cmpi slt, %55, %c1_i32_28 : i32
    %57 = arith.extui %56 : i1 to i32
    %c0_i32_29 = arith.constant 0 : i32
    %58 = arith.cmpi ne, %57, %c0_i32_29 : i32
    scf.if %58 {
      %c0_30 = arith.constant 0 : index
      %c0_31 = arith.constant 0 : index
      %c14 = arith.constant 14 : index
      %59 = vector.load %arg2[%c0_30, %c0_31, %c14] : memref<2x4x16xf32, #tpu.memory_space<vmem>>, vector<2x4x2xf32>
      %c0_32 = arith.constant 0 : index
      %c0_33 = arith.constant 0 : index
      %c0_34 = arith.constant 0 : index
      %60 = vector.load %arg6[%c0_32, %c0_33, %c0_34] : memref<2x4x2xf32, #tpu.memory_space<vmem>>, vector<2x4x2xf32>
      tpu.vector_store %arg6[%c0_32, %c0_33, %c0_34], %59 {strides = array<i32>} : memref<2x4x2xf32, #tpu.memory_space<vmem>>, vector<2x4x2xf32>,
    } else {
    }
    return
  }
  func.func @transform_0(%arg0: i32, %arg1: i32) -> (i32, i32, i32) {
    %c0_i32 = arith.constant 0 : i32
    %c0_i32_0 = arith.constant 0 : i32
    return %arg0, %c0_i32, %arg1 : i32, i32, i32
  }
  func.func @transform_1(%arg0: i32, %arg1: i32) -> (i32, i32) {
    %c0_i32 = arith.constant 0 : i32
    %c0_i32_0 = arith.constant 0 : i32
    %c0_i32_1 = arith.constant 0 : i32
    return %c0_i32, %c0_i32_0 : i32, i32
  }
  func.func @transform_2(%arg0: i32, %arg1: i32) -> (i32, i32) {
    %c0_i32 = arith.constant 0 : i32
    %c0_i32_0 = arith.constant 0 : i32
    %c0_i32_1 = arith.constant 0 : i32
    return %c0_i32, %c0_i32_0 : i32, i32
  }
  func.func @transform_3(%arg0: i32, %arg1: i32) -> (i32, i32, i32) {
    %c0_i32 = arith.constant 0 : i32
    %c0_i32_0 = arith.constant 0 : i32
    return %arg0, %c0_i32, %arg1 : i32, i32, i32
  }
}

</mosaic_0001>

<bundles_post_ra>
// kernel: tpu_custom_call.1
= control target key start
LH: loop header
LB: loop body
LE: loop exit
PB: predicated region body
PF: predicated region fallthrough
CT: control target
= control target key end

     0   :  { %vm18_vm0 = vcmask 11264   ;;  %v301_v1 = vmov 0.0   ;;  %vm47_vm1 = vcmask 64512   ;;  %s302_s16 = smov 2   ;;  %v303_v5 = vmov 0   ;;  %s372_s0 = inlined_call_operand.vmem [shape: f32[2,4,16], index: 0, kind: input, shape index: {}]   ;;  %s373_s1 = inlined_call_operand.vmem [shape: f32[16,8], index: 1, kind: input, shape index: {}]   ;;  %s374_s2 = inlined_call_operand.vmem [shape: f32[16,1], index: 2, kind: input, shape index: {}]   ;;  %s375_s3 = inlined_call_operand.vmem [shape: f32[2,12,16], index: 3, kind: output, shape index: {}]  }
   0x1   :  { %v327_v0 = vld [vmem:[%s372_s0] sm:$0xf]  ;;  %19 = vst.msk [vmem:[#allocation2] sm:$0xf] %vm18_vm0, %v301_v1  ;;  %20 = vst.msk [vmem:[#allocation2 + $0x4] sm:$0xf] %vm18_vm0, %v301_v1  ;;  %291 = vset.pattern.permute.xlu1 %v303_v5  ;;  %292 = vset.pattern.permute.xlu0 %v303_v5 }
   0x2   :  { %v21_v2 = vld [vmem:[%s373_s1] sm:$0xff]  ;;  %28 = vrot.lane.b32.xlu0 %v327_v0, %s302_s16  ;;  %v24_v3 = vld [vmem:[%s374_s2 + $0x8] sm:$0xff]  ;;  %v33_v7 = vrot.slane %v327_v0, 4  ;;  %vm31_vm2 = vcmask 15360   ;;  %vm35_vm3 = vcmask 1043456   ;;  %vm141_vm4 = vcmask 125952  }
   0x3   :  { %280 = vmatprep.mubr.msk.f32.mxu0 %vm47_vm1, %v21_v2  ;;  %v340_v4 = vld [vmem:[%s372_s0 + $0x4] sm:$0xf]  ;;  %285 = vmatprep.mubr.msk.f32.mxu1 %vm47_vm1, %v21_v2  ;;  %v22_v13 = vld [vmem:[%s373_s1 + $0x8] sm:$0xff]  ;;  %vm139_vm5 = vcmask 130048  }
   0x4   :  { %44 = vperm.xlu1 %291, %v24_v3   ;;  %v23_v6 = vld [vmem:[%s374_s2] sm:$0xff]  ;;  %v152_v11 = vrot.slane %v340_v4, 4 }
   0x6   :  { %148 = vrot.lane.b32.xlu0 %v340_v4, %s302_s16 }
   0x8   :  { %39 = vperm.xlu1 %291, %v23_v6   ;;  %v26_v8 = vld [vmem:[#allocation2] sm:$0xf]  ;;  %v146_v14 = vld [vmem:[#allocation2 + $0x4] sm:$0xf] }
  0x74   :  { %v29_v9 = vpop.permute.xlu0 %28 }
  0x75   :  { %v32_v10 = vsel %vm31_vm2, %v26_v8, %v29_v9 }
  0x76   :  { %v36_v12 = vsel %vm35_vm3, %v32_v10, %v33_v7 }
  0x77   :  { %278 = vmatprep.subr.mxu0 %v36_v12 }
  0x78   :  { %v149_v15 = vpop.permute.xlu0 %148  ;;  %279 = vmatpush3.msra.mxu0 %v36_v12 }
  0x79   :  { %v151_v16 = vsel %vm31_vm2, %v146_v14, %v149_v15  ;;  %281 = vmatmul.mubr.msk.f32.vlgmr.msra.gmra.mrb[0].mxu0 %vm47_vm1, %v22_v13 }
  0x7a   :  { %v154_v17 = vsel %vm35_vm3, %v151_v16, %v152_v11 }
  0x7b   :  { %283 = vmatprep.subr.mxu1 %v154_v17 }
  0x7c   :  { %284 = vmatpush3.msra.mxu1 %v154_v17 }
  0x7d   :  { %286 = vmatmul.mubr.msk.f32.vlgmr.msra.gmra.mrb[0].mxu1 %vm47_vm1, %v22_v13 }
  0x83   :  { %v45_v18 = vpop.permute.xlu1 %44 }
  0x87   :  { %v40_v21 = vpop.permute.xlu1 %39 }
 0x14c   :  { %v282_v19 = vpop.f32.mrb[0].mxu0 }
 0x14d   :  { %v126_v20 = vadd.f32 %v282_v19, %v45_v18  ;;  %v120_v22 = vpop.f32.mrb[1].mxu0 }
 0x14e   :  { %v121_v24 = vadd.f32 %v120_v22, %v40_v21 }
 0x14f   :  { %v130_v23 = vmul.f32 0.5, %v126_v20 }
 0x150   :  { %v287_v25 = vpop.f32.mrb[0].mxu1 }
 0x151   :  { %293 = vtanh.f32 %v130_v23  ;;  %v227_v26 = vadd.f32 %v287_v25, %v45_v18  ;;  %v221_v27 = vpop.f32.mrb[1].mxu1 }
 0x152   :  { %295 = vtanh.f32 %v121_v24  ;;  %v222_v29 = vadd.f32 %v221_v27, %v40_v21 }
 0x153   :  { %v231_v28 = vmul.f32 0.5, %v227_v26 }
 0x155   :  { %297 = vtanh.f32 %v231_v28 }
 0x156   :  { %299 = vtanh.f32 %v222_v29 }
 0x15b   :  { %v294_v30 = vpop.eup %293 }
 0x15c   :  { %v132_v31 = vadd.f32 1.0, %v294_v30  ;;  %v296_v32 = vpop.eup %295 }
 0x15e   :  { %v133_v33 = vmul.f32 0.5, %v132_v31 }
 0x15f   :  { %v298_v34 = vpop.eup %297 }
 0x160   :  { %v134_v35 = vmul.f32 %v296_v32, %v133_v33  ;;  %v233_v36 = vadd.f32 1.0, %v298_v34  ;;  %v300_v39 = vpop.eup %299 }
 0x162   :  { %v136_v37 = vrot.slane %v134_v35, 4  ;;  %v234_v38 = vmul.f32 0.5, %v233_v36 }
 0x164   :  { %v138_v40 = vsel %vm35_vm3, %v327_v0, %v136_v37  ;;  %142 = vst.msk [vmem:[%s375_s3 + $0x8] sm:$0xf] %vm141_vm4, %v136_v37  ;;  %v235_v41 = vmul.f32 %v300_v39, %v234_v38 }
 0x165   :  { %140 = vst.msk [vmem:[%s375_s3] sm:$0xff] %vm139_vm5, %v138_v40 }
 0x166   :  { %v237_v42 = vrot.slane %v235_v41, 4 }
 0x168   :  { %v239_v43 = vsel %vm35_vm3, %v340_v4, %v237_v42  ;;  %271 = vst.msk [vmem:[%s375_s3 + $0x18] sm:$0xf] %vm141_vm4, %v237_v42 }
 0x169   :  { %270 = vst.msk [vmem:[%s375_s3 + $0x10] sm:$0xff] %vm139_vm5, %v239_v43 }

</bundles_post_ra>
